<compile_context>
chip_gen: v5e
topology: v5e:2x2
jax: 0.10.0
libtpu: 0.0.40
codegen_flags: <defaults>
</compile_context>

<pallas_src>
import functools

import jax
import jax.numpy as jnp
from jax.experimental import pallas as pl
from jax.experimental.pallas import tpu as pltpu


# ----------------------------- Pallas kernel ---------------------------------

def _conv_layer_kernel(x_ref, w_ref, b_ref, o_ref, *, pair_max: bool):
    """Fused 3-tap conv layer for one batch element.

    x_ref: (1, Lb, Cin_eff)    activation rows (f32 or bf16)
    w_ref: (3*Cin_eff, Cout_eff)  fused tap weights (bf16)
    b_ref: (1, Cout_eff)       bias (f32)
    o_ref: (1, Lb, Cout_out)   Cout_out = Cout_eff//2 if pair_max else Cout_eff
    """
    h = x_ref[0].astype(jnp.float32)                        # (Lb, Cin_eff)
    lb, cin = h.shape

    # Build the three shifted taps in-register (zero 'same' padding at the ends).
    zero = jnp.zeros((1, cin), jnp.float32)
    h_m1 = jnp.concatenate([zero, h[: lb - 1, :]], axis=0)   # h_m1[i] = h[i-1]
    h_p1 = jnp.concatenate([h[1:, :], zero], axis=0)         # h_p1[i] = h[i+1]
    taps = jnp.concatenate([h_m1, h, h_p1], axis=1)          # (Lb, 3*Cin_eff)

    # One wide MXU matmul, bf16 inputs, f32 accumulation.
    acc = jnp.dot(taps.astype(jnp.bfloat16), w_ref[...],
                  preferred_element_type=jnp.float32)        # (Lb, Cout_eff)
    acc = acc + b_ref[...]

    if pair_max:
        # Fused MaxPool1d(2): the two column halves are the even/odd conv rows.
        half = acc.shape[1] // 2
        acc = jnp.maximum(acc[:, :half], acc[:, half:])

    # ELU(alpha=1), f32 epilogue.
    out = jnp.where(acc > 0.0, acc, jnp.exp(jnp.minimum(acc, 0.0)) - 1.0)
    o_ref[0] = out.astype(o_ref.dtype)


def fused_conv_layer(x, w, b, *, pair_max: bool, out_dtype):
    """x: (N, Lb, Cin_eff), w: (3*Cin_eff, Cout_eff), b: (1, Cout_eff)."""
    n, lb, cin_eff = x.shape
    k, cout_eff = w.shape
    cout_out = cout_eff // 2 if pair_max else cout_eff
    kernel = functools.partial(_conv_layer_kernel, pair_max=pair_max)
    return pl.pallas_call(
        kernel,
        out_shape=jax.ShapeDtypeStruct((n, lb, cout_out), out_dtype),
        grid=(n,),
        in_specs=[
            pl.BlockSpec((1, lb, cin_eff), lambda i: (i, 0, 0)),   # pipelined per batch
            pl.BlockSpec((k, cout_eff), lambda i: (0, 0)),         # weights stay resident
            pl.BlockSpec((1, cout_eff), lambda i: (0, 0)),         # bias stays resident
        ],
        out_specs=pl.BlockSpec((1, lb, cout_out), lambda i: (i, 0, 0)),
        compiler_params=pltpu.CompilerParams(
            dimension_semantics=("parallel",)),
    )(x, w, b)


# ------------------------- parameter preprocessing ----------------------------

def _conv_taps(w):
    # PyTorch Conv1d weight (Cout, Cin, 3) -> conv taps (3, Cin, Cout)
    return jnp.transpose(w, (2, 1, 0))


def _convT_taps(w):
    # PyTorch ConvTranspose1d weight (Cin, Cout, 3), stride=1, pad=1:
    # equivalent conv taps = flipped kernel, (Cin, Cout) orientation.
    return jnp.transpose(w[:, :, ::-1], (2, 0, 1))


def _plain_matrix(taps, b):
    # y[i] = x[i-1] w0 + x[i] w1 + x[i+1] w2 + b
    _, cin, cout = taps.shape
    return (taps.reshape(3 * cin, cout).astype(jnp.bfloat16),
            b.reshape(1, cout).astype(jnp.float32))


def _pool_matrix(taps, b):
    # Conv + MaxPool(2): paired input rows [x[2i] | x[2i+1]] (Cin_eff = 2*Cin);
    # taps give blocks x[2i-2..2i+3]; column halves are y[2i] and y[2i+1].
    _, cin, cout = taps.shape
    w0, w1, w2 = taps[0], taps[1], taps[2]
    W = jnp.zeros((6 * cin, 2 * cout), jnp.float32)
    W = W.at[1 * cin:2 * cin, :cout].set(w0)    # y_even: x[2i-1] w0
    W = W.at[2 * cin:3 * cin, :cout].set(w1)    #         x[2i]   w1
    W = W.at[3 * cin:4 * cin, :cout].set(w2)    #         x[2i+1] w2
    W = W.at[2 * cin:3 * cin, cout:].set(w0)    # y_odd : x[2i]   w0
    W = W.at[3 * cin:4 * cin, cout:].set(w1)    #         x[2i+1] w1
    W = W.at[4 * cin:5 * cin, cout:].set(w2)    #         x[2i+2] w2
    b2 = jnp.concatenate([b, b]).reshape(1, 2 * cout)
    return W.astype(jnp.bfloat16), b2.astype(jnp.float32)


def _upsample_matrix(taps, b):
    # Upsample(x2, nearest) + conv, computed at low resolution:
    #   y[2i]   = z[i-1] w0 + z[i] (w1+w2)
    #   y[2i+1] = z[i] (w0+w1) + z[i+1] w2
    # Column halves hold the even/odd output phases.
    _, cin, cout = taps.shape
    w0, w1, w2 = taps[0], taps[1], taps[2]
    W = jnp.zeros((3 * cin, 2 * cout), jnp.float32)
    W = W.at[0:cin, :cout].set(w0)
    W = W.at[cin:2 * cin, :cout].set(w1 + w2)
    W = W.at[cin:2 * cin, cout:].set(w0 + w1)
    W = W.at[2 * cin:3 * cin, cout:].set(w2)
    b2 = jnp.concatenate([b, b]).reshape(1, 2 * cout)
    return W.astype(jnp.bfloat16), b2.astype(jnp.float32)


def init_params(channels=1, seed=42):
    key = jax.random.PRNGKey(seed)
    ks = jax.random.split(key, 12)
    w = lambda k, s: 0.1 * jax.random.normal(k, s, dtype=jnp.float32)

    # PyTorch-layout weights -> equivalent conv taps (3, Cin, Cout) + bias.
    taps = {
        "e1": (_conv_taps(w(ks[0], (16, channels, 3))), w(ks[1], (16,))),
        "e2": (_conv_taps(w(ks[2], (32, 16, 3))), w(ks[3], (32,))),
        "e3": (_conv_taps(w(ks[4], (64, 32, 3))), w(ks[5], (64,))),
        "d1": (_convT_taps(w(ks[6], (64, 32, 3))), w(ks[7], (32,))),
        "d2": (_convT_taps(w(ks[8], (32, 16, 3))), w(ks[9], (16,))),
        "d3": (_convT_taps(w(ks[10], (16, channels, 3))), w(ks[11], (channels,))),
    }

    builders = {"e1": _pool_matrix, "e2": _pool_matrix, "e3": _plain_matrix,
                "d1": _upsample_matrix, "d2": _upsample_matrix, "d3": _plain_matrix}
    params = {}
    for name, build in builders.items():
        W, b = build(*taps[name])
        params[f"{name}_W"] = W
        params[f"{name}_b"] = b
    return params, taps


# ------------------------------ forward pass ----------------------------------

def cnn_autoencoder_v2_forward(x_ncl, params):
    """x_ncl: (N, C, L) like PyTorch; returns (N, C, L) float32."""
    n, c, l = x_ncl.shape
    assert l % 4 == 0, "length must be divisible by 4 (two pool/upsample stages)"
    act = jnp.bfloat16  # intermediate activation dtype (halves HBM traffic)

    x = jnp.transpose(x_ncl, (0, 2, 1)).astype(jnp.float32)   # NCL -> NLC (free for C==1)

    # encoder: conv+ELU+pool fused (paired rows on lanes; reshapes are free row-major)
    h = fused_conv_layer(x.reshape(n, l // 2, 2 * c),
                         params["e1_W"], params["e1_b"],
                         pair_max=True, out_dtype=act)                 # (n, l/2, 16)
    h = fused_conv_layer(h.reshape(n, l // 4, 2 * 16),
                         params["e2_W"], params["e2_b"],
                         pair_max=True, out_dtype=act)                 # (n, l/4, 32)
    h = fused_conv_layer(h, params["e3_W"], params["e3_b"],
                         pair_max=False, out_dtype=act)                # (n, l/4, 64)

    # decoder: upsample+convT+ELU fused (even/odd phases in lane halves; free reshape interleaves)
    h = fused_conv_layer(h, params["d1_W"], params["d1_b"],
                         pair_max=False, out_dtype=act)                # (n, l/4, 64)
    h = h.reshape(n, l // 2, 32)
    h = fused_conv_layer(h, params["d2_W"], params["d2_b"],
                         pair_max=False, out_dtype=act)                # (n, l/2, 32)
    h = h.reshape(n, l, 16)
    y = fused_conv_layer(h, params["d3_W"], params["d3_b"],
                         pair_max=False, out_dtype=jnp.float32)        # (n, l, c)

    return jnp.transpose(y, (0, 2, 1))                                 # NLC -> NCL


# ------------------------- pure-JAX f32 reference ------------------------------

def _elu(v):
    return jnp.where(v > 0.0, v, jnp.exp(jnp.minimum(v, 0.0)) - 1.0)


def _ref_conv3(x, taps, b):
    n, l, _ = x.shape
    xp = jnp.pad(x, ((0, 0), (1, 1), (0, 0)))
    y = jnp.zeros((n, l, taps.shape[-1]), jnp.float32) + b
    for k in range(3):
        y = y + jnp.einsum("nlc,cd->nld", xp[:, k:k + l, :], taps[k])
    return y


def reference_forward(x_ncl, taps):
    x = jnp.transpose(x_ncl, (0, 2, 1)).astype(jnp.float32)
    n, l, _ = x.shape
    h = _elu(_ref_conv3(x, *taps["e1"]))
    h = jnp.max(h.reshape(n, l // 2, 2, -1), axis=2)
    h = _elu(_ref_conv3(h, *taps["e2"]))
    h = jnp.max(h.reshape(n, l // 4, 2, -1), axis=2)
    h = _elu(_ref_conv3(h, *taps["e3"]))
    h = _elu(_ref_conv3(jnp.repeat(h, 2, axis=1), *taps["d1"]))
    h = _elu(_ref_conv3(jnp.repeat(h, 2, axis=1), *taps["d2"]))
    h = _elu(_ref_conv3(h, *taps["d3"]))
    return jnp.transpose(h, (0, 2, 1))


# ----------------------------------- main ---------------------------------------

if __name__ == "__main__":
    N, C, L = 2, 1, 16   # no_channels=1 (module default); L divisible by 4
    x = jax.random.normal(jax.random.PRNGKey(0), (N, C, L), dtype=jnp.float32)
    params, ref_taps = init_params(channels=C, seed=42)

    fwd = jax.jit(cnn_autoencoder_v2_forward)
    y = jax.block_until_ready(fwd(x, params))

    assert y.shape == (N, C, L), y.shape
    assert y.dtype == jnp.float32
    assert bool(jnp.all(jnp.isfinite(y)))

    # Correctness against an f32 pure-JAX reference of the PyTorch module
    # (tolerance accounts for bf16 weights/activations in the Pallas path).
    y_ref = reference_forward(x, ref_taps)
    err = float(jnp.max(jnp.abs(y - y_ref)))
    assert err < 0.05, f"max abs error vs reference: {err}"

    print("KERNEL_OK")
</pallas_src>

<mosaic_0001>
module attributes {stable_mosaic.version = 11 : i64} {
  func.func @_conv_layer_kernel(%arg0: i32, %arg1: memref<1x4x32xbf16, #tpu.memory_space<vmem>>, %arg2: memref<96x64xbf16, #tpu.memory_space<vmem>>, %arg3: memref<1x64xf32, #tpu.memory_space<vmem>>, %arg4: memref<1x4x64xbf16, #tpu.memory_space<vmem>>) attributes {dimension_semantics = [#tpu.dimension_semantics<parallel>], iteration_bounds = array<i64: 2>, scalar_prefetch = 0 : i64, scratch_operands = 0 : i64, tpu.core_type = #tpu.core_type<tc>, window_params = [{transform_indices = @transform_0, window_bounds = array<i64: 1, 4, 32>}, {pipeline_mode = #tpu.pipeline_mode<synchronous>, transform_indices = @transform_1, window_bounds = array<i64: 96, 64>}, {pipeline_mode = #tpu.pipeline_mode<synchronous>, transform_indices = @transform_2, window_bounds = array<i64: 1, 64>}, {transform_indices = @transform_3, window_bounds = array<i64: 1, 4, 64>}]} {
    %c0 = arith.constant 0 : index
    %c0_0 = arith.constant 0 : index
    %c0_1 = arith.constant 0 : index
    %0 = vector.load %arg1[%c0, %c0_0, %c0_1] : memref<1x4x32xbf16, #tpu.memory_space<vmem>>, vector<1x4x32xbf16>
    %1 = vector.shape_cast %0 : vector<1x4x32xbf16> to vector<4x32xbf16>
    %2 = arith.extf %1 : vector<4x32xbf16> to vector<4x32xf32>
    %cst = arith.constant 0.000000e+00 : f32
    %3 = vector.broadcast %cst : f32 to vector<1x32xf32>
    %4 = vector.extract_strided_slice %2 {offsets = [0, 0], sizes = [3, 32], strides = [1, 1]} : vector<4x32xf32> to vector<3x32xf32>
    %5 = tpu.concatenate %3, %4 in 0 : vector<1x32xf32>, vector<3x32xf32> -> vector<4x32xf32>
    %6 = vector.extract_strided_slice %2 {offsets = [1, 0], sizes = [3, 32], strides = [1, 1]} : vector<4x32xf32> to vector<3x32xf32>
    %7 = tpu.concatenate %6, %3 in 0 : vector<3x32xf32>, vector<1x32xf32> -> vector<4x32xf32>
    %8 = tpu.concatenate %5, %2, %7 in 1 : vector<4x32xf32>, vector<4x32xf32>, vector<4x32xf32> -> vector<4x96xf32>
    %9 = arith.truncf %8 : vector<4x96xf32> to vector<4x96xbf16>
    %c0_2 = arith.constant 0 : index
    %c0_3 = arith.constant 0 : index
    %10 = vector.load %arg2[%c0_2, %c0_3] : memref<96x64xbf16, #tpu.memory_space<vmem>>, vector<96x64xbf16>
    %cst_4 = arith.constant dense<0.000000e+00> : vector<4x64xf32>
    %11 = tpu.matmul %9, %10, %cst_4 {dimension_numbers = #tpu.dot_dimension_numbers<[1], [0], [0], [1], [0, 0, 1, 1], [], []>} : vector<4x96xbf16>, vector<96x64xbf16>, vector<4x64xf32> -> vector<4x64xf32>
    %c0_5 = arith.constant 0 : index
    %c0_6 = arith.constant 0 : index
    %12 = vector.load %arg3[%c0_5, %c0_6] : memref<1x64xf32, #tpu.memory_space<vmem>>, vector<1x64xf32>
    %13 = vector.broadcast %12 : vector<1x64xf32> to vector<4x64xf32>
    %14 = arith.addf %11, %13 : vector<4x64xf32>
    %cst_7 = arith.constant 0.000000e+00 : f32
    %15 = vector.broadcast %cst_7 : f32 to vector<4x64xf32>
    %16 = arith.cmpf ogt, %14, %15 : vector<4x64xf32>
    %cst_8 = arith.constant 0.000000e+00 : f32
    %17 = vector.broadcast %cst_8 : f32 to vector<4x64xf32>
    %18 = arith.minimumf %14, %17 : vector<4x64xf32>
    %19 = math.exp %18 : vector<4x64xf32>
    %cst_9 = arith.constant 1.000000e+00 : f32
    %20 = vector.broadcast %cst_9 : f32 to vector<4x64xf32>
    %21 = arith.subf %19, %20 : vector<4x64xf32>
    %22 = arith.select %16, %14, %21 : vector<4x64xi1>, vector<4x64xf32>
    %23 = arith.truncf %22 : vector<4x64xf32> to vector<4x64xbf16>
    %c0_10 = arith.constant 0 : index
    %c0_11 = arith.constant 0 : index
    %c0_12 = arith.constant 0 : index
    %24 = vector.load %arg4[%c0_10, %c0_11, %c0_12] : memref<1x4x64xbf16, #tpu.memory_space<vmem>>, vector<1x4x64xbf16>
    %25 = vector.shape_cast %24 : vector<1x4x64xbf16> to vector<4x64xbf16>
    %26 = vector.shape_cast %23 : vector<4x64xbf16> to vector<1x4x64xbf16>
    tpu.vector_store %arg4[%c0_10, %c0_11, %c0_12], %26 {strides = array<i32>} : memref<1x4x64xbf16, #tpu.memory_space<vmem>>, vector<1x4x64xbf16>,
    return
  }
  func.func @transform_0(%arg0: i32) -> (i32, i32, i32) {
    %c0_i32 = arith.constant 0 : i32
    %c0_i32_0 = arith.constant 0 : i32
    %c0_i32_1 = arith.constant 0 : i32
    return %arg0, %c0_i32, %c0_i32_0 : i32, i32, i32
  }
  func.func @transform_1(%arg0: i32) -> (i32, i32) {
    %c0_i32 = arith.constant 0 : i32
    %c0_i32_0 = arith.constant 0 : i32
    %c0_i32_1 = arith.constant 0 : i32
    return %c0_i32, %c0_i32_0 : i32, i32
  }
  func.func @transform_2(%arg0: i32) -> (i32, i32) {
    %c0_i32 = arith.constant 0 : i32
    %c0_i32_0 = arith.constant 0 : i32
    %c0_i32_1 = arith.constant 0 : i32
    return %c0_i32, %c0_i32_0 : i32, i32
  }
  func.func @transform_3(%arg0: i32) -> (i32, i32, i32) {
    %c0_i32 = arith.constant 0 : i32
    %c0_i32_0 = arith.constant 0 : i32
    %c0_i32_1 = arith.constant 0 : i32
    return %arg0, %c0_i32, %c0_i32_0 : i32, i32, i32
  }
}

module attributes {stable_mosaic.version = 11 : i64} {
  func.func @_conv_layer_kernel(%arg0: i32, %arg1: memref<1x4x32xbf16, #tpu.memory_space<vmem>>, %arg2: memref<96x64xbf16, #tpu.memory_space<vmem>>, %arg3: memref<1x64xf32, #tpu.memory_space<vmem>>, %arg4: memref<1x4x32xbf16, #tpu.memory_space<vmem>>) attributes {dimension_semantics = [#tpu.dimension_semantics<parallel>], iteration_bounds = array<i64: 2>, scalar_prefetch = 0 : i64, scratch_operands = 0 : i64, tpu.core_type = #tpu.core_type<tc>, window_params = [{transform_indices = @transform_0, window_bounds = array<i64: 1, 4, 32>}, {pipeline_mode = #tpu.pipeline_mode<synchronous>, transform_indices = @transform_1, window_bounds = array<i64: 96, 64>}, {pipeline_mode = #tpu.pipeline_mode<synchronous>, transform_indices = @transform_2, window_bounds = array<i64: 1, 64>}, {transform_indices = @transform_3, window_bounds = array<i64: 1, 4, 32>}]} {
    %c0 = arith.constant 0 : index
    %c0_0 = arith.constant 0 : index
    %c0_1 = arith.constant 0 : index
    %0 = vector.load %arg1[%c0, %c0_0, %c0_1] : memref<1x4x32xbf16, #tpu.memory_space<vmem>>, vector<1x4x32xbf16>
    %1 = vector.shape_cast %0 : vector<1x4x32xbf16> to vector<4x32xbf16>
    %2 = arith.extf %1 : vector<4x32xbf16> to vector<4x32xf32>
    %cst = arith.constant 0.000000e+00 : f32
    %3 = vector.broadcast %cst : f32 to vector<1x32xf32>
    %4 = vector.extract_strided_slice %2 {offsets = [0, 0], sizes = [3, 32], strides = [1, 1]} : vector<4x32xf32> to vector<3x32xf32>
    %5 = tpu.concatenate %3, %4 in 0 : vector<1x32xf32>, vector<3x32xf32> -> vector<4x32xf32>
    %6 = vector.extract_strided_slice %2 {offsets = [1, 0], sizes = [3, 32], strides = [1, 1]} : vector<4x32xf32> to vector<3x32xf32>
    %7 = tpu.concatenate %6, %3 in 0 : vector<3x32xf32>, vector<1x32xf32> -> vector<4x32xf32>
    %8 = tpu.concatenate %5, %2, %7 in 1 : vector<4x32xf32>, vector<4x32xf32>, vector<4x32xf32> -> vector<4x96xf32>
    %9 = arith.truncf %8 : vector<4x96xf32> to vector<4x96xbf16>
    %c0_2 = arith.constant 0 : index
    %c0_3 = arith.constant 0 : index
    %10 = vector.load %arg2[%c0_2, %c0_3] : memref<96x64xbf16, #tpu.memory_space<vmem>>, vector<96x64xbf16>
    %cst_4 = arith.constant dense<0.000000e+00> : vector<4x64xf32>
    %11 = tpu.matmul %9, %10, %cst_4 {dimension_numbers = #tpu.dot_dimension_numbers<[1], [0], [0], [1], [0, 0, 1, 1], [], []>} : vector<4x96xbf16>, vector<96x64xbf16>, vector<4x64xf32> -> vector<4x64xf32>
    %c0_5 = arith.constant 0 : index
    %c0_6 = arith.constant 0 : index
    %12 = vector.load %arg3[%c0_5, %c0_6] : memref<1x64xf32, #tpu.memory_space<vmem>>, vector<1x64xf32>
    %13 = vector.broadcast %12 : vector<1x64xf32> to vector<4x64xf32>
    %14 = arith.addf %11, %13 : vector<4x64xf32>
    %15 = vector.extract_strided_slice %14 {offsets = [0, 0], sizes = [4, 32], strides = [1, 1]} : vector<4x64xf32> to vector<4x32xf32>
    %16 = vector.extract_strided_slice %14 {offsets = [0, 32], sizes = [4, 32], strides = [1, 1]} : vector<4x64xf32> to vector<4x32xf32>
    %17 = arith.maximumf %15, %16 : vector<4x32xf32>
    %cst_7 = arith.constant 0.000000e+00 : f32
    %18 = vector.broadcast %cst_7 : f32 to vector<4x32xf32>
    %19 = arith.cmpf ogt, %17, %18 : vector<4x32xf32>
    %cst_8 = arith.constant 0.000000e+00 : f32
    %20 = vector.broadcast %cst_8 : f32 to vector<4x32xf32>
    %21 = arith.minimumf %17, %20 : vector<4x32xf32>
    %22 = math.exp %21 : vector<4x32xf32>
    %cst_9 = arith.constant 1.000000e+00 : f32
    %23 = vector.broadcast %cst_9 : f32 to vector<4x32xf32>
    %24 = arith.subf %22, %23 : vector<4x32xf32>
    %25 = arith.select %19, %17, %24 : vector<4x32xi1>, vector<4x32xf32>
    %26 = arith.truncf %25 : vector<4x32xf32> to vector<4x32xbf16>
    %c0_10 = arith.constant 0 : index
    %c0_11 = arith.constant 0 : index
    %c0_12 = arith.constant 0 : index
    %27 = vector.load %arg4[%c0_10, %c0_11, %c0_12] : memref<1x4x32xbf16, #tpu.memory_space<vmem>>, vector<1x4x32xbf16>
    %28 = vector.shape_cast %27 : vector<1x4x32xbf16> to vector<4x32xbf16>
    %29 = vector.shape_cast %26 : vector<4x32xbf16> to vector<1x4x32xbf16>
    tpu.vector_store %arg4[%c0_10, %c0_11, %c0_12], %29 {strides = array<i32>} : memref<1x4x32xbf16, #tpu.memory_space<vmem>>, vector<1x4x32xbf16>,
    return
  }
  func.func @transform_0(%arg0: i32) -> (i32, i32, i32) {
    %c0_i32 = arith.constant 0 : i32
    %c0_i32_0 = arith.constant 0 : i32
    %c0_i32_1 = arith.constant 0 : i32
    return %arg0, %c0_i32, %c0_i32_0 : i32, i32, i32
  }
  func.func @transform_1(%arg0: i32) -> (i32, i32) {
    %c0_i32 = arith.constant 0 : i32
    %c0_i32_0 = arith.constant 0 : i32
    %c0_i32_1 = arith.constant 0 : i32
    return %c0_i32, %c0_i32_0 : i32, i32
  }
  func.func @transform_2(%arg0: i32) -> (i32, i32) {
    %c0_i32 = arith.constant 0 : i32
    %c0_i32_0 = arith.constant 0 : i32
    %c0_i32_1 = arith.constant 0 : i32
    return %c0_i32, %c0_i32_0 : i32, i32
  }
  func.func @transform_3(%arg0: i32) -> (i32, i32, i32) {
    %c0_i32 = arith.constant 0 : i32
    %c0_i32_0 = arith.constant 0 : i32
    %c0_i32_1 = arith.constant 0 : i32
    return %arg0, %c0_i32, %c0_i32_0 : i32, i32, i32
  }
}

module attributes {stable_mosaic.version = 11 : i64} {
  func.func @_conv_layer_kernel(%arg0: i32, %arg1: memref<1x8x2xf32, #tpu.memory_space<vmem>>, %arg2: memref<6x32xbf16, #tpu.memory_space<vmem>>, %arg3: memref<1x32xf32, #tpu.memory_space<vmem>>, %arg4: memref<1x8x16xbf16, #tpu.memory_space<vmem>>) attributes {dimension_semantics = [#tpu.dimension_semantics<parallel>], iteration_bounds = array<i64: 2>, scalar_prefetch = 0 : i64, scratch_operands = 0 : i64, tpu.core_type = #tpu.core_type<tc>, window_params = [{transform_indices = @transform_0, window_bounds = array<i64: 1, 8, 2>}, {pipeline_mode = #tpu.pipeline_mode<synchronous>, transform_indices = @transform_1, window_bounds = array<i64: 6, 32>}, {pipeline_mode = #tpu.pipeline_mode<synchronous>, transform_indices = @transform_2, window_bounds = array<i64: 1, 32>}, {transform_indices = @transform_3, window_bounds = array<i64: 1, 8, 16>}]} {
    %c0 = arith.constant 0 : index
    %c0_0 = arith.constant 0 : index
    %c0_1 = arith.constant 0 : index
    %0 = vector.load %arg1[%c0, %c0_0, %c0_1] : memref<1x8x2xf32, #tpu.memory_space<vmem>>, vector<1x8x2xf32>
    %1 = vector.shape_cast %0 : vector<1x8x2xf32> to vector<8x2xf32>
    %cst = arith.constant 0.000000e+00 : f32
    %2 = vector.broadcast %cst : f32 to vector<1x2xf32>
    %3 = vector.extract_strided_slice %1 {offsets = [0, 0], sizes = [7, 2], strides = [1, 1]} : vector<8x2xf32> to vector<7x2xf32>
    %4 = tpu.concatenate %2, %3 in 0 : vector<1x2xf32>, vector<7x2xf32> -> vector<8x2xf32>
    %5 = vector.extract_strided_slice %1 {offsets = [1, 0], sizes = [7, 2], strides = [1, 1]} : vector<8x2xf32> to vector<7x2xf32>
    %6 = tpu.concatenate %5, %2 in 0 : vector<7x2xf32>, vector<1x2xf32> -> vector<8x2xf32>
    %7 = tpu.concatenate %4, %1, %6 in 1 : vector<8x2xf32>, vector<8x2xf32>, vector<8x2xf32> -> vector<8x6xf32>
    %8 = arith.truncf %7 : vector<8x6xf32> to vector<8x6xbf16>
    %c0_2 = arith.constant 0 : index
    %c0_3 = arith.constant 0 : index
    %9 = vector.load %arg2[%c0_2, %c0_3] : memref<6x32xbf16, #tpu.memory_space<vmem>>, vector<6x32xbf16>
    %cst_4 = arith.constant dense<0.000000e+00> : vector<8x32xf32>
    %10 = tpu.matmul %8, %9, %cst_4 {dimension_numbers = #tpu.dot_dimension_numbers<[1], [0], [0], [1], [0, 0, 1, 1], [], []>} : vector<8x6xbf16>, vector<6x32xbf16>, vector<8x32xf32> -> vector<8x32xf32>
    %c0_5 = arith.constant 0 : index
    %c0_6 = arith.constant 0 : index
    %11 = vector.load %arg3[%c0_5, %c0_6] : memref<1x32xf32, #tpu.memory_space<vmem>>, vector<1x32xf32>
    %12 = vector.broadcast %11 : vector<1x32xf32> to vector<8x32xf32>
    %13 = arith.addf %10, %12 : vector<8x32xf32>
    %14 = vector.extract_strided_slice %13 {offsets = [0, 0], sizes = [8, 16], strides = [1, 1]} : vector<8x32xf32> to vector<8x16xf32>
    %15 = vector.extract_strided_slice %13 {offsets = [0, 16], sizes = [8, 16], strides = [1, 1]} : vector<8x32xf32> to vector<8x16xf32>
    %16 = arith.maximumf %14, %15 : vector<8x16xf32>
    %cst_7 = arith.constant 0.000000e+00 : f32
    %17 = vector.broadcast %cst_7 : f32 to vector<8x16xf32>
    %18 = arith.cmpf ogt, %16, %17 : vector<8x16xf32>
    %cst_8 = arith.constant 0.000000e+00 : f32
    %19 = vector.broadcast %cst_8 : f32 to vector<8x16xf32>
    %20 = arith.minimumf %16, %19 : vector<8x16xf32>
    %21 = math.exp %20 : vector<8x16xf32>
    %cst_9 = arith.constant 1.000000e+00 : f32
    %22 = vector.broadcast %cst_9 : f32 to vector<8x16xf32>
    %23 = arith.subf %21, %22 : vector<8x16xf32>
    %24 = arith.select %18, %16, %23 : vector<8x16xi1>, vector<8x16xf32>
    %25 = arith.truncf %24 : vector<8x16xf32> to vector<8x16xbf16>
    %c0_10 = arith.constant 0 : index
    %c0_11 = arith.constant 0 : index
    %c0_12 = arith.constant 0 : index
    %26 = vector.load %arg4[%c0_10, %c0_11, %c0_12] : memref<1x8x16xbf16, #tpu.memory_space<vmem>>, vector<1x8x16xbf16>
    %27 = vector.shape_cast %26 : vector<1x8x16xbf16> to vector<8x16xbf16>
    %28 = vector.shape_cast %25 : vector<8x16xbf16> to vector<1x8x16xbf16>
    tpu.vector_store %arg4[%c0_10, %c0_11, %c0_12], %28 {strides = array<i32>} : memref<1x8x16xbf16, #tpu.memory_space<vmem>>, vector<1x8x16xbf16>,
    return
  }
  func.func @transform_0(%arg0: i32) -> (i32, i32, i32) {
    %c0_i32 = arith.constant 0 : i32
    %c0_i32_0 = arith.constant 0 : i32
    %c0_i32_1 = arith.constant 0 : i32
    return %arg0, %c0_i32, %c0_i32_0 : i32, i32, i32
  }
  func.func @transform_1(%arg0: i32) -> (i32, i32) {
    %c0_i32 = arith.constant 0 : i32
    %c0_i32_0 = arith.constant 0 : i32
    %c0_i32_1 = arith.constant 0 : i32
    return %c0_i32, %c0_i32_0 : i32, i32
  }
  func.func @transform_2(%arg0: i32) -> (i32, i32) {
    %c0_i32 = arith.constant 0 : i32
    %c0_i32_0 = arith.constant 0 : i32
    %c0_i32_1 = arith.constant 0 : i32
    return %c0_i32, %c0_i32_0 : i32, i32
  }
  func.func @transform_3(%arg0: i32) -> (i32, i32, i32) {
    %c0_i32 = arith.constant 0 : i32
    %c0_i32_0 = arith.constant 0 : i32
    %c0_i32_1 = arith.constant 0 : i32
    return %arg0, %c0_i32, %c0_i32_0 : i32, i32, i32
  }
}

module attributes {stable_mosaic.version = 11 : i64} {
  func.func @_conv_layer_kernel(%arg0: i32, %arg1: memref<1x4x64xbf16, #tpu.memory_space<vmem>>, %arg2: memref<192x64xbf16, #tpu.memory_space<vmem>>, %arg3: memref<1x64xf32, #tpu.memory_space<vmem>>, %arg4: memref<1x4x64xbf16, #tpu.memory_space<vmem>>) attributes {dimension_semantics = [#tpu.dimension_semantics<parallel>], iteration_bounds = array<i64: 2>, scalar_prefetch = 0 : i64, scratch_operands = 0 : i64, tpu.core_type = #tpu.core_type<tc>, window_params = [{transform_indices = @transform_0, window_bounds = array<i64: 1, 4, 64>}, {pipeline_mode = #tpu.pipeline_mode<synchronous>, transform_indices = @transform_1, window_bounds = array<i64: 192, 64>}, {pipeline_mode = #tpu.pipeline_mode<synchronous>, transform_indices = @transform_2, window_bounds = array<i64: 1, 64>}, {transform_indices = @transform_3, window_bounds = array<i64: 1, 4, 64>}]} {
    %c0 = arith.constant 0 : index
    %c0_0 = arith.constant 0 : index
    %c0_1 = arith.constant 0 : index
    %0 = vector.load %arg1[%c0, %c0_0, %c0_1] : memref<1x4x64xbf16, #tpu.memory_space<vmem>>, vector<1x4x64xbf16>
    %1 = vector.shape_cast %0 : vector<1x4x64xbf16> to vector<4x64xbf16>
    %2 = arith.extf %1 : vector<4x64xbf16> to vector<4x64xf32>
    %cst = arith.constant 0.000000e+00 : f32
    %3 = vector.broadcast %cst : f32 to vector<1x64xf32>
    %4 = vector.extract_strided_slice %2 {offsets = [0, 0], sizes = [3, 64], strides = [1, 1]} : vector<4x64xf32> to vector<3x64xf32>
    %5 = tpu.concatenate %3, %4 in 0 : vector<1x64xf32>, vector<3x64xf32> -> vector<4x64xf32>
    %6 = vector.extract_strided_slice %2 {offsets = [1, 0], sizes = [3, 64], strides = [1, 1]} : vector<4x64xf32> to vector<3x64xf32>
    %7 = tpu.concatenate %6, %3 in 0 : vector<3x64xf32>, vector<1x64xf32> -> vector<4x64xf32>
    %8 = tpu.concatenate %5, %2, %7 in 1 : vector<4x64xf32>, vector<4x64xf32>, vector<4x64xf32> -> vector<4x192xf32>
    %9 = arith.truncf %8 : vector<4x192xf32> to vector<4x192xbf16>
    %c0_2 = arith.constant 0 : index
    %c0_3 = arith.constant 0 : index
    %10 = vector.load %arg2[%c0_2, %c0_3] : memref<192x64xbf16, #tpu.memory_space<vmem>>, vector<192x64xbf16>
    %cst_4 = arith.constant dense<0.000000e+00> : vector<4x64xf32>
    %11 = tpu.matmul %9, %10, %cst_4 {dimension_numbers = #tpu.dot_dimension_numbers<[1], [0], [0], [1], [0, 0, 1, 1], [], []>} : vector<4x192xbf16>, vector<192x64xbf16>, vector<4x64xf32> -> vector<4x64xf32>
    %c0_5 = arith.constant 0 : index
    %c0_6 = arith.constant 0 : index
    %12 = vector.load %arg3[%c0_5, %c0_6] : memref<1x64xf32, #tpu.memory_space<vmem>>, vector<1x64xf32>
    %13 = vector.broadcast %12 : vector<1x64xf32> to vector<4x64xf32>
    %14 = arith.addf %11, %13 : vector<4x64xf32>
    %cst_7 = arith.constant 0.000000e+00 : f32
    %15 = vector.broadcast %cst_7 : f32 to vector<4x64xf32>
    %16 = arith.cmpf ogt, %14, %15 : vector<4x64xf32>
    %cst_8 = arith.constant 0.000000e+00 : f32
    %17 = vector.broadcast %cst_8 : f32 to vector<4x64xf32>
    %18 = arith.minimumf %14, %17 : vector<4x64xf32>
    %19 = math.exp %18 : vector<4x64xf32>
    %cst_9 = arith.constant 1.000000e+00 : f32
    %20 = vector.broadcast %cst_9 : f32 to vector<4x64xf32>
    %21 = arith.subf %19, %20 : vector<4x64xf32>
    %22 = arith.select %16, %14, %21 : vector<4x64xi1>, vector<4x64xf32>
    %23 = arith.truncf %22 : vector<4x64xf32> to vector<4x64xbf16>
    %c0_10 = arith.constant 0 : index
    %c0_11 = arith.constant 0 : index
    %c0_12 = arith.constant 0 : index
    %24 = vector.load %arg4[%c0_10, %c0_11, %c0_12] : memref<1x4x64xbf16, #tpu.memory_space<vmem>>, vector<1x4x64xbf16>
    %25 = vector.shape_cast %24 : vector<1x4x64xbf16> to vector<4x64xbf16>
    %26 = vector.shape_cast %23 : vector<4x64xbf16> to vector<1x4x64xbf16>
    tpu.vector_store %arg4[%c0_10, %c0_11, %c0_12], %26 {strides = array<i32>} : memref<1x4x64xbf16, #tpu.memory_space<vmem>>, vector<1x4x64xbf16>,
    return
  }
  func.func @transform_0(%arg0: i32) -> (i32, i32, i32) {
    %c0_i32 = arith.constant 0 : i32
    %c0_i32_0 = arith.constant 0 : i32
    %c0_i32_1 = arith.constant 0 : i32
    return %arg0, %c0_i32, %c0_i32_0 : i32, i32, i32
  }
  func.func @transform_1(%arg0: i32) -> (i32, i32) {
    %c0_i32 = arith.constant 0 : i32
    %c0_i32_0 = arith.constant 0 : i32
    %c0_i32_1 = arith.constant 0 : i32
    return %c0_i32, %c0_i32_0 : i32, i32
  }
  func.func @transform_2(%arg0: i32) -> (i32, i32) {
    %c0_i32 = arith.constant 0 : i32
    %c0_i32_0 = arith.constant 0 : i32
    %c0_i32_1 = arith.constant 0 : i32
    return %c0_i32, %c0_i32_0 : i32, i32
  }
  func.func @transform_3(%arg0: i32) -> (i32, i32, i32) {
    %c0_i32 = arith.constant 0 : i32
    %c0_i32_0 = arith.constant 0 : i32
    %c0_i32_1 = arith.constant 0 : i32
    return %arg0, %c0_i32, %c0_i32_0 : i32, i32, i32
  }
}

module attributes {stable_mosaic.version = 11 : i64} {
  func.func @_conv_layer_kernel(%arg0: i32, %arg1: memref<1x8x32xbf16, #tpu.memory_space<vmem>>, %arg2: memref<96x32xbf16, #tpu.memory_space<vmem>>, %arg3: memref<1x32xf32, #tpu.memory_space<vmem>>, %arg4: memref<1x8x32xbf16, #tpu.memory_space<vmem>>) attributes {dimension_semantics = [#tpu.dimension_semantics<parallel>], iteration_bounds = array<i64: 2>, scalar_prefetch = 0 : i64, scratch_operands = 0 : i64, tpu.core_type = #tpu.core_type<tc>, window_params = [{transform_indices = @transform_0, window_bounds = array<i64: 1, 8, 32>}, {pipeline_mode = #tpu.pipeline_mode<synchronous>, transform_indices = @transform_1, window_bounds = array<i64: 96, 32>}, {pipeline_mode = #tpu.pipeline_mode<synchronous>, transform_indices = @transform_2, window_bounds = array<i64: 1, 32>}, {transform_indices = @transform_3, window_bounds = array<i64: 1, 8, 32>}]} {
    %c0 = arith.constant 0 : index
    %c0_0 = arith.constant 0 : index
    %c0_1 = arith.constant 0 : index
    %0 = vector.load %arg1[%c0, %c0_0, %c0_1] : memref<1x8x32xbf16, #tpu.memory_space<vmem>>, vector<1x8x32xbf16>
    %1 = vector.shape_cast %0 : vector<1x8x32xbf16> to vector<8x32xbf16>
    %2 = arith.extf %1 : vector<8x32xbf16> to vector<8x32xf32>
    %cst = arith.constant 0.000000e+00 : f32
    %3 = vector.broadcast %cst : f32 to vector<1x32xf32>
    %4 = vector.extract_strided_slice %2 {offsets = [0, 0], sizes = [7, 32], strides = [1, 1]} : vector<8x32xf32> to vector<7x32xf32>
    %5 = tpu.concatenate %3, %4 in 0 : vector<1x32xf32>, vector<7x32xf32> -> vector<8x32xf32>
    %6 = vector.extract_strided_slice %2 {offsets = [1, 0], sizes = [7, 32], strides = [1, 1]} : vector<8x32xf32> to vector<7x32xf32>
    %7 = tpu.concatenate %6, %3 in 0 : vector<7x32xf32>, vector<1x32xf32> -> vector<8x32xf32>
    %8 = tpu.concatenate %5, %2, %7 in 1 : vector<8x32xf32>, vector<8x32xf32>, vector<8x32xf32> -> vector<8x96xf32>
    %9 = arith.truncf %8 : vector<8x96xf32> to vector<8x96xbf16>
    %c0_2 = arith.constant 0 : index
    %c0_3 = arith.constant 0 : index
    %10 = vector.load %arg2[%c0_2, %c0_3] : memref<96x32xbf16, #tpu.memory_space<vmem>>, vector<96x32xbf16>
    %cst_4 = arith.constant dense<0.000000e+00> : vector<8x32xf32>
    %11 = tpu.matmul %9, %10, %cst_4 {dimension_numbers = #tpu.dot_dimension_numbers<[1], [0], [0], [1], [0, 0, 1, 1], [], []>} : vector<8x96xbf16>, vector<96x32xbf16>, vector<8x32xf32> -> vector<8x32xf32>
    %c0_5 = arith.constant 0 : index
    %c0_6 = arith.constant 0 : index
    %12 = vector.load %arg3[%c0_5, %c0_6] : memref<1x32xf32, #tpu.memory_space<vmem>>, vector<1x32xf32>
    %13 = vector.broadcast %12 : vector<1x32xf32> to vector<8x32xf32>
    %14 = arith.addf %11, %13 : vector<8x32xf32>
    %cst_7 = arith.constant 0.000000e+00 : f32
    %15 = vector.broadcast %cst_7 : f32 to vector<8x32xf32>
    %16 = arith.cmpf ogt, %14, %15 : vector<8x32xf32>
    %cst_8 = arith.constant 0.000000e+00 : f32
    %17 = vector.broadcast %cst_8 : f32 to vector<8x32xf32>
    %18 = arith.minimumf %14, %17 : vector<8x32xf32>
    %19 = math.exp %18 : vector<8x32xf32>
    %cst_9 = arith.constant 1.000000e+00 : f32
    %20 = vector.broadcast %cst_9 : f32 to vector<8x32xf32>
    %21 = arith.subf %19, %20 : vector<8x32xf32>
    %22 = arith.select %16, %14, %21 : vector<8x32xi1>, vector<8x32xf32>
    %23 = arith.truncf %22 : vector<8x32xf32> to vector<8x32xbf16>
    %c0_10 = arith.constant 0 : index
    %c0_11 = arith.constant 0 : index
    %c0_12 = arith.constant 0 : index
    %24 = vector.load %arg4[%c0_10, %c0_11, %c0_12] : memref<1x8x32xbf16, #tpu.memory_space<vmem>>, vector<1x8x32xbf16>
    %25 = vector.shape_cast %24 : vector<1x8x32xbf16> to vector<8x32xbf16>
    %26 = vector.shape_cast %23 : vector<8x32xbf16> to vector<1x8x32xbf16>
    tpu.vector_store %arg4[%c0_10, %c0_11, %c0_12], %26 {strides = array<i32>} : memref<1x8x32xbf16, #tpu.memory_space<vmem>>, vector<1x8x32xbf16>,
    return
  }
  func.func @transform_0(%arg0: i32) -> (i32, i32, i32) {
    %c0_i32 = arith.constant 0 : i32
    %c0_i32_0 = arith.constant 0 : i32
    %c0_i32_1 = arith.constant 0 : i32
    return %arg0, %c0_i32, %c0_i32_0 : i32, i32, i32
  }
  func.func @transform_1(%arg0: i32) -> (i32, i32) {
    %c0_i32 = arith.constant 0 : i32
    %c0_i32_0 = arith.constant 0 : i32
    %c0_i32_1 = arith.constant 0 : i32
    return %c0_i32, %c0_i32_0 : i32, i32
  }
  func.func @transform_2(%arg0: i32) -> (i32, i32) {
    %c0_i32 = arith.constant 0 : i32
    %c0_i32_0 = arith.constant 0 : i32
    %c0_i32_1 = arith.constant 0 : i32
    return %c0_i32, %c0_i32_0 : i32, i32
  }
  func.func @transform_3(%arg0: i32) -> (i32, i32, i32) {
    %c0_i32 = arith.constant 0 : i32
    %c0_i32_0 = arith.constant 0 : i32
    %c0_i32_1 = arith.constant 0 : i32
    return %arg0, %c0_i32, %c0_i32_0 : i32, i32, i32
  }
}

module attributes {stable_mosaic.version = 11 : i64} {
  func.func @_conv_layer_kernel(%arg0: i32, %arg1: memref<1x16x16xbf16, #tpu.memory_space<vmem>>, %arg2: memref<48x1xbf16, #tpu.memory_space<vmem>>, %arg3: memref<1x1xf32, #tpu.memory_space<vmem>>, %arg4: memref<1x16x1xf32, #tpu.memory_space<vmem>>) attributes {dimension_semantics = [#tpu.dimension_semantics<parallel>], iteration_bounds = array<i64: 2>, scalar_prefetch = 0 : i64, scratch_operands = 0 : i64, tpu.core_type = #tpu.core_type<tc>, window_params = [{transform_indices = @transform_0, window_bounds = array<i64: 1, 16, 16>}, {pipeline_mode = #tpu.pipeline_mode<synchronous>, transform_indices = @transform_1, window_bounds = array<i64: 48, 1>}, {pipeline_mode = #tpu.pipeline_mode<synchronous>, transform_indices = @transform_2, window_bounds = array<i64: 1, 1>}, {transform_indices = @transform_3, window_bounds = array<i64: 1, 16, 1>}]} {
    %c0 = arith.constant 0 : index
    %c0_0 = arith.constant 0 : index
    %c0_1 = arith.constant 0 : index
    %0 = vector.load %arg1[%c0, %c0_0, %c0_1] : memref<1x16x16xbf16, #tpu.memory_space<vmem>>, vector<1x16x16xbf16>
    %1 = vector.shape_cast %0 : vector<1x16x16xbf16> to vector<16x16xbf16>
    %2 = arith.extf %1 : vector<16x16xbf16> to vector<16x16xf32>
    %cst = arith.constant 0.000000e+00 : f32
    %3 = vector.broadcast %cst : f32 to vector<1x16xf32>
    %4 = vector.extract_strided_slice %2 {offsets = [0, 0], sizes = [15, 16], strides = [1, 1]} : vector<16x16xf32> to vector<15x16xf32>
    %5 = tpu.concatenate %3, %4 in 0 : vector<1x16xf32>, vector<15x16xf32> -> vector<16x16xf32>
    %6 = vector.extract_strided_slice %2 {offsets = [1, 0], sizes = [15, 16], strides = [1, 1]} : vector<16x16xf32> to vector<15x16xf32>
    %7 = tpu.concatenate %6, %3 in 0 : vector<15x16xf32>, vector<1x16xf32> -> vector<16x16xf32>
    %8 = tpu.concatenate %5, %2, %7 in 1 : vector<16x16xf32>, vector<16x16xf32>, vector<16x16xf32> -> vector<16x48xf32>
    %9 = arith.truncf %8 : vector<16x48xf32> to vector<16x48xbf16>
    %c0_2 = arith.constant 0 : index
    %c0_3 = arith.constant 0 : index
    %10 = vector.load %arg2[%c0_2, %c0_3] : memref<48x1xbf16, #tpu.memory_space<vmem>>, vector<48x1xbf16>
    %cst_4 = arith.constant dense<0.000000e+00> : vector<16x1xf32>
    %11 = tpu.matmul %9, %10, %cst_4 {dimension_numbers = #tpu.dot_dimension_numbers<[1], [0], [0], [1], [0, 0, 1, 1], [], []>} : vector<16x48xbf16>, vector<48x1xbf16>, vector<16x1xf32> -> vector<16x1xf32>
    %c0_5 = arith.constant 0 : index
    %c0_6 = arith.constant 0 : index
    %12 = vector.load %arg3[%c0_5, %c0_6] : memref<1x1xf32, #tpu.memory_space<vmem>>, vector<1x1xf32>
    %13 = vector.broadcast %12 : vector<1x1xf32> to vector<16x1xf32>
    %14 = arith.addf %11, %13 : vector<16x1xf32>
    %cst_7 = arith.constant 0.000000e+00 : f32
    %15 = vector.broadcast %cst_7 : f32 to vector<16x1xf32>
    %16 = arith.cmpf ogt, %14, %15 : vector<16x1xf32>
    %cst_8 = arith.constant 0.000000e+00 : f32
    %17 = vector.broadcast %cst_8 : f32 to vector<16x1xf32>
    %18 = arith.minimumf %14, %17 : vector<16x1xf32>
    %19 = math.exp %18 : vector<16x1xf32>
    %cst_9 = arith.constant 1.000000e+00 : f32
    %20 = vector.broadcast %cst_9 : f32 to vector<16x1xf32>
    %21 = arith.subf %19, %20 : vector<16x1xf32>
    %22 = arith.select %16, %14, %21 : vector<16x1xi1>, vector<16x1xf32>
    %c0_10 = arith.constant 0 : index
    %c0_11 = arith.constant 0 : index
    %c0_12 = arith.constant 0 : index
    %23 = vector.load %arg4[%c0_10, %c0_11, %c0_12] : memref<1x16x1xf32, #tpu.memory_space<vmem>>, vector<1x16x1xf32>
    %24 = vector.shape_cast %23 : vector<1x16x1xf32> to vector<16x1xf32>
    %25 = vector.shape_cast %22 : vector<16x1xf32> to vector<1x16x1xf32>
    tpu.vector_store %arg4[%c0_10, %c0_11, %c0_12], %25 {strides = array<i32>} : memref<1x16x1xf32, #tpu.memory_space<vmem>>, vector<1x16x1xf32>,
    return
  }
  func.func @transform_0(%arg0: i32) -> (i32, i32, i32) {
    %c0_i32 = arith.constant 0 : i32
    %c0_i32_0 = arith.constant 0 : i32
    %c0_i32_1 = arith.constant 0 : i32
    return %arg0, %c0_i32, %c0_i32_0 : i32, i32, i32
  }
  func.func @transform_1(%arg0: i32) -> (i32, i32) {
    %c0_i32 = arith.constant 0 : i32
    %c0_i32_0 = arith.constant 0 : i32
    %c0_i32_1 = arith.constant 0 : i32
    return %c0_i32, %c0_i32_0 : i32, i32
  }
  func.func @transform_2(%arg0: i32) -> (i32, i32) {
    %c0_i32 = arith.constant 0 : i32
    %c0_i32_0 = arith.constant 0 : i32
    %c0_i32_1 = arith.constant 0 : i32
    return %c0_i32, %c0_i32_0 : i32, i32
  }
  func.func @transform_3(%arg0: i32) -> (i32, i32, i32) {
    %c0_i32 = arith.constant 0 : i32
    %c0_i32_0 = arith.constant 0 : i32
    %c0_i32_1 = arith.constant 0 : i32
    return %arg0, %c0_i32, %c0_i32_0 : i32, i32, i32
  }
}

</mosaic_0001>

<bundles_post_ra>
// kernel: cnn_autoencoder_v2_forward.7
= control target key start
LH: loop header
LB: loop body
LE: loop exit
PB: predicated region body
PF: predicated region fallthrough
CT: control target
= control target key end

     0   :  { %s418_s12 = smov 0   ;;  %s463_s0 = inlined_call_operand.vmem [shape: bf16[2,4,32], index: 0, kind: input, shape index: {}]   ;;  %s464_s1 = inlined_call_operand.vmem [shape: bf16[96,64], index: 1, kind: input, shape index: {}]   ;;  %s465_s2 = inlined_call_operand.vmem [shape: f32[1,64], index: 2, kind: input, shape index: {}]   ;;  %s466_s3 = inlined_call_operand.vmem [shape: bf16[2,4,32], index: 3, kind: output, shape index: {}]  }
   0x1 LB: > { %s332_s13 = sadd.s32 4294967295, %s393_s12   ;;  %p336_p0 = scmp.ge.s32.totalorder %s393_s12, 1  ;;  %s393_s12 = sphi %s418_s12, %s13_s12  }
   0x2   : > { %p136_p1 = scmp.lt.s32.totalorder %s393_s12, 3 }
   0x4   : > { %p137_p2 = pnand %p336_p0, %p136_p1 }
   0x5   : > { %p158_p3 = scmp.lt.s32.totalorder (!%p137_p2), %s332_s13, 1  ;;  %s395_s24 = smov (!%p137_p2), 32  }
   0x6   : > { %140 = sbr.rel (%p137_p2) target bundleno = 429 (0x1ad), region = 32  ;;  %s396_s25 = smov (!%p137_p2), 64  }
   0x7   : > { %s397_s7 = smov (!%p137_p2), 96  }
   0xb   : > { %s468_s13 = smov (!%p158_p3, %s332_s13), 1  ;;  %v372_v2 = vld [vmem:[%s464_s1 + $0x28] sm:$0xff]  ;;  %v371_v3 = vld [vmem:[%s464_s1 + $0x20] sm:$0xff]  ;;  %v370_v4 = vld [vmem:[%s464_s1 + $0x18] sm:$0xff]  ;;  %vm180_vm0 = vcmask 1042432   ;;  %vm174_vm1 = vcmask 1040384  }
   0xc   : > { %s337_s14 = sshll.u32 %s468_s13, 1  ;;  %254 = vmatpush.bf16.msra.mxu0 %v372_v2  ;;  %v369_v10 = vld [vmem:[%s464_s1 + $0x10] sm:$0xff]  ;;  %v368_v11 = vld [vmem:[%s464_s1 + $0x8] sm:$0xff]  ;;  %v367_v12 = vld [vmem:[%s464_s1] sm:$0xff]  ;;  %vm191_vm2 = vcmask 261120   ;;  %vm193_vm3 = vcmask 523264  }
   0xd   : > { %s161_s17 = scalar_lea.vmem %s463_s0, %s337_s14  ;;  %vm248_vm4 = vcmask 785408   ;;  %v384_v20 = vld [vmem:[%s465_s2] ss:$0 sm:$0xff]  ;;  %s165_s10 = scalar_lea.vmem %s466_s3, %s337_s14  ;;  %vm277_vm6 = vcmask 254976  }
   0xe   : > { %v167_v0 = vld [vmem:[%s161_s17] sm:$0x3] }
   0xf   : > { %v168_v1 = vunpack.c.l.bf16 %v167_v0 }
  0x10   : > { %255 = vmatpush.bf16.msra.mxu0 %v371_v3 }
  0x11   : > { %170 = vst [vmem:[#allocation1] ss:$2 sm:$0xff] %v168_v1 }
  0x14   : > { %256 = vmatpush.bf16.msra.mxu0 %v370_v4 }
  0x18   : > { %v171_v5 = vld.sshfl [vmem:[#allocation1] sm:$0xff pattern:$0x75316420]  ;;  %257 = vmatpush.bf16.msra.mxu0 %v369_v10 }
  0x19   : > { %176 = vst [vmem:[#allocation1] ss:$2 sm:$0xff] %v168_v1  ;;  %v172_v14 = vrot.slane %v171_v5, 7 }
  0x1b   : > { %v175_v15 = vsel %vm174_vm1, 0.0, %v172_v14 }
  0x1c   : > { %258 = vmatpush.bf16.msra.mxu0 %v368_v11 }
  0x20   : > { %v177_v6 = vld.sshfl [vmem:[#allocation1] sm:$0xff pattern:$0x75316420]  ;;  %259 = vmatpush.bf16.msra.mxu0 %v367_v12 }
  0x21   : > { %182 = vst [vmem:[#allocation1] ss:$2 sm:$0xff] %v168_v1  ;;  %v178_v8 = vrot.slane %v177_v6, 1 }
  0x23   : > { %v181_v9 = vsel %vm180_vm0, %v178_v8, 0.0 }
  0x28   : > { %v183_v7 = vld.sshfl [vmem:[#allocation1] sm:$0xff pattern:$0x75316420] }
  0x29   : > { %184 = vrot.lane.b32.xlu0 %v183_v7, %s395_s24 }
  0x31   : > { %188 = vrot.lane.b32.xlu0 %v181_v9, %s396_s25 }
  0x9b   : > { %v185_v13 = vpop.permute.xlu0 %184 }
  0x9c   : > { %v192_v16 = vsel %vm191_vm2, %v175_v15, %v185_v13 }
  0xa3   : > { %v189_v17 = vpop.permute.xlu0 %188 }
  0xa4   : > { %v194_v18 = vsel %vm193_vm3, %v192_v16, %v189_v17 }
  0xa5   : > { %v195_v19 = vpack.c.bf16 %v194_v18, %v194_v18 }
  0xa7   : > { %363 = vmatmul.msk.bf16.vlgmr.msra.gmra.mxu0 %vm248_vm4, %v195_v19 }
 0x124   : > { %v261_v21 = vpop.f32.mrf.mxu0 }
 0x125   : > { %v262_v22 = vadd.f32 %v384_v20, %v261_v21 }
 0x127   : > { %266 = vrot.lane.b32.xlu1 %v262_v22, %s397_s7 }
 0x12c   : > { %v263_v23 = vpop.f32.mrf.mxu0 }
 0x199   : > { %v267_v24 = vpop.permute.xlu1 %266 }
 0x19a   : > { %v269_v25 = vmax.f32 %v262_v22, %v267_v24 }
 0x19c   : > { %v271_v26 = vmin.f32 %v269_v25, 0.0  ;;  %vm270_vm5 = vcmp.gt.f32.partialorder %v269_v25, 0.0 }
 0x19e   : > { %v272_v27 = vmul.f32 1.442695, %v271_v26 }
 0x1a0   : > { %385 = vpow2.f32 %v272_v27 }
 0x1a6   : > { %v386_v28 = vpop.eup %385 }
 0x1a7   : > { %v364_v29 = vadd.f32 -1.0, %v386_v28 }
 0x1a9   : > { %v275_v30 = vsel %vm270_vm5, %v269_v25, %v364_v29 }
 0x1aa   : > { %v276_v31 = vpack.c.bf16 %v275_v30, %v275_v30 }
 0x1ac   : > { %278 = vst.msk [vmem:[%s165_s10] sm:$0x3] %vm277_vm6, %v276_v31 }
 0x1ad PF: > { %s13_s12 = sadd.s32 1, %s393_s12  }
 0x1ae   : > { %p10_p4 = scmp.ge.s32.totalorder %s13_s12, 4  }
 0x1b0   :  { %12 = sbr.rel (!%p10_p4) target bundleno = 1 (0x1), region = 62 }

// kernel: cnn_autoencoder_v2_forward.6
= control target key start
LH: loop header
LB: loop body
LE: loop exit
PB: predicated region body
PF: predicated region fallthrough
CT: control target
= control target key end

     0   :  { %s338_s12 = smov 0   ;;  %s365_s0 = inlined_call_operand.vmem [shape: f32[2,8,2], index: 0, kind: input, shape index: {}]   ;;  %s366_s1 = inlined_call_operand.vmem [shape: bf16[6,32], index: 1, kind: input, shape index: {}]   ;;  %s367_s2 = inlined_call_operand.vmem [shape: f32[1,32], index: 2, kind: input, shape index: {}]   ;;  %s368_s3 = inlined_call_operand.vmem [shape: bf16[2,8,16], index: 3, kind: output, shape index: {}]  }
   0x1 LB: > { %s282_s13 = sadd.s32 4294967295, %s313_s12   ;;  %p286_p0 = scmp.ge.s32.totalorder %s313_s12, 1  ;;  %s313_s12 = sphi %s338_s12, %s13_s12  }
   0x2   : > { %p136_p1 = scmp.lt.s32.totalorder %s313_s12, 3 }
   0x4   : > { %p137_p2 = pnand %p286_p0, %p136_p1 }
   0x5   : > { %p158_p3 = scmp.lt.s32.totalorder (!%p137_p2), %s282_s13, 1  ;;  %s315_s18 = smov (!%p137_p2), 2  }
   0x6   : > { %140 = sbr.rel (%p137_p2) target bundleno = 403 (0x193), region = 32  ;;  %s316_s19 = smov (!%p137_p2), 4  }
   0x7   : > { %s317_s24 = smov (!%p137_p2), 112  }
   0xb   : > { %s370_s13 = smov (!%p158_p3, %s282_s13), 1  ;;  %vm175_vm0 = vcmask 1046528   ;;  %v189_v3 = vld [vmem:[%s366_s1] sm:$0x7]  ;;  %vm198_vm1 = vcmask 1042432   ;;  %vm171_vm2 = vcmask 1040384  }
   0xc   : > { %s287_s14 = sshll.u32 %s370_s13, 3  ;;  %v200_v4 = vsel %vm198_vm1, %v189_v3, 0  ;;  %vm184_vm3 = vcmask 15360   ;;  %vm186_vm4 = vcmask 31744   ;;  %vm194_vm5 = vcmask 48128   ;;  %s288_s25 = sshll.u32 %s370_s13, 2 }
   0xd   : > { %s161_s17 = scalar_lea.vmem %s365_s0, %s287_s14  ;;  %209 = vmatpush.bf16.msra.mxu0 %v200_v4  ;;  %v304_v12 = vld [vmem:[%s367_s2] ss:$0 sm:$0xff]  ;;  %s165_s28 = scalar_lea.vmem %s368_s3, %s288_s25  ;;  %vm227_vm7 = vcmask 125952  }
   0xe   : > { %v167_v0 = vld [vmem:[%s161_s17] sm:$0xff] }
   0xf   : > { %177 = vrot.lane.b32.xlu0 %v167_v0, %s315_s18  ;;  %v173_v1 = vrot.slane %v167_v0, 1  ;;  %v169_v6 = vrot.slane %v167_v0, 7 }
  0x11   : > { %v176_v2 = vsel %vm175_vm0, %v173_v1, 0.0  ;;  %v172_v7 = vsel %vm171_vm2, 0.0, %v169_v6 }
  0x17   : > { %181 = vrot.lane.b32.xlu0 %v176_v2, %s316_s19 }
  0x81   : > { %v178_v5 = vpop.permute.xlu0 %177 }
  0x82   : > { %v185_v8 = vsel %vm184_vm3, %v172_v7, %v178_v5 }
  0x89   : > { %v182_v9 = vpop.permute.xlu0 %181 }
  0x8a   : > { %v187_v10 = vsel %vm186_vm4, %v185_v8, %v182_v9 }
  0x8b   : > { %v188_v11 = vpack.c.bf16 %v187_v10, %v187_v10 }
  0x8d   : > { %289 = vmatmul.msk.bf16.vlgmr.msra.gmra.mxu0 %vm194_vm5, %v188_v11 }
 0x10a   : > { %v211_v13 = vpop.f32.mrf.mxu0 }
 0x10b   : > { %v212_v14 = vadd.f32 %v304_v12, %v211_v13 }
 0x10d   : > { %216 = vrot.lane.b32.xlu1 %v212_v14, %s317_s24 }
 0x112   : > { %v213_v15 = vpop.f32.mrf.mxu0 }
 0x17f   : > { %v217_v16 = vpop.permute.xlu1 %216 }
 0x180   : > { %v219_v17 = vmax.f32 %v212_v14, %v217_v16 }
 0x182   : > { %v221_v18 = vmin.f32 %v219_v17, 0.0  ;;  %vm220_vm6 = vcmp.gt.f32.partialorder %v219_v17, 0.0 }
 0x184   : > { %v222_v19 = vmul.f32 1.442695, %v221_v18 }
 0x186   : > { %305 = vpow2.f32 %v222_v19 }
 0x18c   : > { %v306_v20 = vpop.eup %305 }
 0x18d   : > { %v290_v21 = vadd.f32 -1.0, %v306_v20 }
 0x18f   : > { %v225_v22 = vsel %vm220_vm6, %v219_v17, %v290_v21 }
 0x190   : > { %v226_v23 = vpack.c.bf16 %v225_v22, %v225_v22 }
 0x192   : > { %228 = vst.msk [vmem:[%s165_s28] sm:$0xf] %vm227_vm7, %v226_v23 }
 0x193 PF: > { %s13_s12 = sadd.s32 1, %s313_s12  }
 0x194   : > { %p10_p4 = scmp.ge.s32.totalorder %s13_s12, 4  }
 0x196   :  { %12 = sbr.rel (!%p10_p4) target bundleno = 1 (0x1), region = 62 }

// kernel: cnn_autoencoder_v2_forward.8
= control target key start
LH: loop header
LB: loop body
LE: loop exit
PB: predicated region body
PF: predicated region fallthrough
CT: control target
= control target key end

     0   :  { %s411_s12 = smov 0   ;;  %s456_s0 = inlined_call_operand.vmem [shape: bf16[2,4,32], index: 0, kind: input, shape index: {}]   ;;  %s457_s1 = inlined_call_operand.vmem [shape: bf16[96,64], index: 1, kind: input, shape index: {}]   ;;  %s458_s2 = inlined_call_operand.vmem [shape: f32[1,64], index: 2, kind: input, shape index: {}]   ;;  %s459_s3 = inlined_call_operand.vmem [shape: bf16[2,4,64], index: 3, kind: output, shape index: {}]  }
   0x1 LB: > { %s327_s13 = sadd.s32 4294967295, %s387_s12   ;;  %p331_p0 = scmp.ge.s32.totalorder %s387_s12, 1  ;;  %s387_s12 = sphi %s411_s12, %s13_s12  }
   0x2   : > { %p136_p1 = scmp.lt.s32.totalorder %s387_s12, 3 }
   0x4   : > { %p137_p2 = pnand %p331_p0, %p136_p1 }
   0x5   : > { %p158_p3 = scmp.lt.s32.totalorder (!%p137_p2), %s327_s13, 1  ;;  %s389_s24 = smov (!%p137_p2), 32  }
   0x6   : > { %140 = sbr.rel (%p137_p2) target bundleno = 312 (0x138), region = 32  ;;  %s390_s25 = smov (!%p137_p2), 64  }
   0xb   : > { %s461_s13 = smov (!%p158_p3, %s327_s13), 1  ;;  %v367_v2 = vld [vmem:[%s457_s1 + $0x28] sm:$0xff]  ;;  %v366_v3 = vld [vmem:[%s457_s1 + $0x20] sm:$0xff]  ;;  %v365_v4 = vld [vmem:[%s457_s1 + $0x18] sm:$0xff]  ;;  %vm180_vm0 = vcmask 1042432   ;;  %vm174_vm1 = vcmask 1040384  }
   0xc   : > { %s332_s14 = sshll.u32 %s461_s13, 1  ;;  %254 = vmatpush.bf16.msra.mxu0 %v367_v2  ;;  %v364_v10 = vld [vmem:[%s457_s1 + $0x10] sm:$0xff]  ;;  %v363_v11 = vld [vmem:[%s457_s1 + $0x8] sm:$0xff]  ;;  %v362_v12 = vld [vmem:[%s457_s1] sm:$0xff]  ;;  %vm191_vm2 = vcmask 261120   ;;  %vm193_vm3 = vcmask 523264  }
   0xd   : > { %s161_s17 = scalar_lea.vmem %s456_s0, %s332_s14  ;;  %vm248_vm4 = vcmask 785408   ;;  %v378_v20 = vld [vmem:[%s458_s2] ss:$0 sm:$0xff]  ;;  %s165_s9 = scalar_lea.vmem %s459_s3, %s332_s14  ;;  %vm272_vm6 = vcmask 517120  }
   0xe   : > { %v167_v0 = vld [vmem:[%s161_s17] sm:$0x3] }
   0xf   : > { %v168_v1 = vunpack.c.l.bf16 %v167_v0 }
  0x10   : > { %255 = vmatpush.bf16.msra.mxu0 %v366_v3 }
  0x11   : > { %170 = vst [vmem:[#allocation1] ss:$2 sm:$0xff] %v168_v1 }
  0x14   : > { %256 = vmatpush.bf16.msra.mxu0 %v365_v4 }
  0x18   : > { %v171_v5 = vld.sshfl [vmem:[#allocation1] sm:$0xff pattern:$0x75316420]  ;;  %257 = vmatpush.bf16.msra.mxu0 %v364_v10 }
  0x19   : > { %176 = vst [vmem:[#allocation1] ss:$2 sm:$0xff] %v168_v1  ;;  %v172_v14 = vrot.slane %v171_v5, 7 }
  0x1b   : > { %v175_v15 = vsel %vm174_vm1, 0.0, %v172_v14 }
  0x1c   : > { %258 = vmatpush.bf16.msra.mxu0 %v363_v11 }
  0x20   : > { %v177_v6 = vld.sshfl [vmem:[#allocation1] sm:$0xff pattern:$0x75316420]  ;;  %259 = vmatpush.bf16.msra.mxu0 %v362_v12 }
  0x21   : > { %182 = vst [vmem:[#allocation1] ss:$2 sm:$0xff] %v168_v1  ;;  %v178_v8 = vrot.slane %v177_v6, 1 }
  0x23   : > { %v181_v9 = vsel %vm180_vm0, %v178_v8, 0.0 }
  0x28   : > { %v183_v7 = vld.sshfl [vmem:[#allocation1] sm:$0xff pattern:$0x75316420] }
  0x29   : > { %184 = vrot.lane.b32.xlu0 %v183_v7, %s389_s24 }
  0x31   : > { %188 = vrot.lane.b32.xlu0 %v181_v9, %s390_s25 }
  0x9b   : > { %v185_v13 = vpop.permute.xlu0 %184 }
  0x9c   : > { %v192_v16 = vsel %vm191_vm2, %v175_v15, %v185_v13 }
  0xa3   : > { %v189_v17 = vpop.permute.xlu0 %188 }
  0xa4   : > { %v194_v18 = vsel %vm193_vm3, %v192_v16, %v189_v17 }
  0xa5   : > { %v195_v19 = vpack.c.bf16 %v194_v18, %v194_v18 }
  0xa7   : > { %358 = vmatmul.msk.bf16.vlgmr.msra.gmra.mxu0 %vm248_vm4, %v195_v19 }
 0x124   : > { %v261_v21 = vpop.f32.mrf.mxu0 }
 0x125   : > { %v262_v22 = vadd.f32 %v378_v20, %v261_v21 }
 0x127   : > { %v266_v23 = vmin.f32 %v262_v22, 0.0  ;;  %vm265_vm5 = vcmp.gt.f32.partialorder %v262_v22, 0.0 }
 0x129   : > { %v267_v24 = vmul.f32 1.442695, %v266_v23 }
 0x12b   : > { %379 = vpow2.f32 %v267_v24 }
 0x12c   : > { %v263_v25 = vpop.f32.mrf.mxu0 }
 0x131   : > { %v380_v26 = vpop.eup %379 }
 0x132   : > { %v359_v27 = vadd.f32 -1.0, %v380_v26 }
 0x134   : > { %v270_v28 = vsel %vm265_vm5, %v262_v22, %v359_v27 }
 0x135   : > { %v271_v29 = vpack.c.bf16 %v270_v28, %v270_v28 }
 0x137   : > { %273 = vst.msk [vmem:[%s165_s9] sm:$0x3] %vm272_vm6, %v271_v29 }
 0x138 PF: > { %s13_s12 = sadd.s32 1, %s387_s12  }
 0x139   : > { %p10_p4 = scmp.ge.s32.totalorder %s13_s12, 4  }
 0x13b   :  { %12 = sbr.rel (!%p10_p4) target bundleno = 1 (0x1), region = 62 }

// kernel: cnn_autoencoder_v2_forward.9
= control target key start
LH: loop header
LB: loop body
LE: loop exit
PB: predicated region body
PF: predicated region fallthrough
CT: control target
= control target key end

     0   :  { %s494_s12 = smov 0   ;;  %s557_s0 = inlined_call_operand.vmem [shape: bf16[2,4,64], index: 0, kind: input, shape index: {}]   ;;  %s558_s1 = inlined_call_operand.vmem [shape: bf16[192,64], index: 1, kind: input, shape index: {}]   ;;  %s559_s2 = inlined_call_operand.vmem [shape: f32[1,64], index: 2, kind: input, shape index: {}]   ;;  %s560_s3 = inlined_call_operand.vmem [shape: bf16[2,4,64], index: 3, kind: output, shape index: {}]  }
   0x1 LB: > { %s382_s13 = sadd.s32 4294967295, %s471_s12   ;;  %p386_p0 = scmp.ge.s32.totalorder %s471_s12, 1  ;;  %s471_s12 = sphi %s494_s12, %s13_s12  }
   0x2   : > { %p136_p1 = scmp.lt.s32.totalorder %s471_s12, 3 }
   0x4   : > { %p137_p2 = pnand %p386_p0, %p136_p1 }
   0x5   : > { %p158_p3 = scmp.lt.s32.totalorder (!%p137_p2), %s382_s13, 1  ;;  %s473_s15 = smov (!%p137_p2), 64  }
   0x6   : > { %140 = sbr.rel (%p137_p2) target bundleno = 306 (0x132), region = 32 }
   0xb   : > { %v448_v0 = vld [vmem:[%s558_s1 + $0x38] sm:$0xff]  ;;  %s562_s13 = smov (!%p158_p3, %s382_s13), 1  ;;  %v447_v2 = vld [vmem:[%s558_s1 + $0x30] sm:$0xff]  ;;  %v446_v6 = vld [vmem:[%s558_s1 + $0x28] sm:$0xff]  ;;  %vm180_vm0 = vcmask 1042432   ;;  %vm187_vm1 = vcmask 523264  }
   0xc   : > { %v452_v1 = vld [vmem:[%s558_s1 + $0x58] sm:$0xff]  ;;  %294 = vmatpush.bf16.msra.mxu0 %v448_v0  ;;  %s387_s20 = sshll.u32 %s562_s13, 1  ;;  %v451_v3 = vld [vmem:[%s558_s1 + $0x50] sm:$0xff]  ;;  %v450_v7 = vld [vmem:[%s558_s1 + $0x48] sm:$0xff]  ;;  %vm174_vm2 = vcmask 1040384   ;;  %vm327_vm4 = vcmask 517120  }
   0xd   : > { %311 = vmatpush.bf16.msra.mxu1 %v452_v1  ;;  %s161_s25 = scalar_lea.vmem %s557_s0, %s387_s20  ;;  %v445_v8 = vld [vmem:[%s558_s1 + $0x20] sm:$0xff]  ;;  %v444_v10 = vld [vmem:[%s558_s1 + $0x18] sm:$0xff]  ;;  %v443_v12 = vld [vmem:[%s558_s1 + $0x10] sm:$0xff]  ;;  %s165_s23 = scalar_lea.vmem %s560_s3, %s387_s20 }
   0xe   : > { %v167_v4 = vld [vmem:[%s161_s25] sm:$0x3]  ;;  %v442_v13 = vld [vmem:[%s558_s1 + $0x8] sm:$0xff] }
   0xf   : > { %v168_v5 = vunpack.c.l.bf16 %v167_v4  ;;  %v449_v9 = vld [vmem:[%s558_s1 + $0x40] sm:$0xff] }
  0x10   : > { %295 = vmatpush.bf16.msra.mxu0 %v447_v2  ;;  %v441_v19 = vld [vmem:[%s558_s1] sm:$0xff] }
  0x11   : > { %312 = vmatpush.bf16.msra.mxu1 %v451_v3  ;;  %170 = vst [vmem:[#allocation1] ss:$2 sm:$0xff] %v168_v5  ;;  %v462_v27 = vld [vmem:[%s559_s2] ss:$0 sm:$0xff] }
  0x14   : > { %296 = vmatpush.bf16.msra.mxu0 %v446_v6 }
  0x15   : > { %313 = vmatpush.bf16.msra.mxu1 %v450_v7 }
  0x18   : > { %297 = vmatpush.bf16.msra.mxu0 %v445_v8  ;;  %v171_v11 = vld.sshfl [vmem:[#allocation1] sm:$0xff pattern:$0x75316420] }
  0x19   : > { %314 = vmatpush.bf16.msra.mxu1 %v449_v9  ;;  %176 = vst [vmem:[#allocation1] ss:$2 sm:$0xff] %v168_v5  ;;  %v172_v20 = vrot.slane %v171_v11, 7 }
  0x1b   : > { %v175_v21 = vsel %vm174_vm2, 0.0, %v172_v20 }
  0x1c   : > { %298 = vmatpush.bf16.msra.mxu0 %v444_v10 }
  0x20   : > { %299 = vmatpush.bf16.msra.mxu0 %v443_v12  ;;  %v177_v14 = vld.sshfl [vmem:[#allocation1] sm:$0xff pattern:$0x75316420] }
  0x21   : > { %182 = vst [vmem:[#allocation1] ss:$2 sm:$0xff] %v168_v5  ;;  %v178_v15 = vrot.slane %v177_v14, 1 }
  0x23   : > { %v181_v16 = vsel %vm180_vm0, %v178_v15, 0.0 }
  0x24   : > { %300 = vmatpush.bf16.msra.mxu0 %v442_v13  ;;  %v190_v17 = vpack.c.bf16 %v181_v16, %v181_v16 }
  0x26   : > { %437 = vmatmul.msk.bf16.vlgmr.msra.gmra.mxu1 %vm187_vm1, %v190_v17 }
  0x28   : > { %v183_v18 = vld.sshfl [vmem:[#allocation1] sm:$0xff pattern:$0x75316420]  ;;  %301 = vmatpush.bf16.msra.mxu0 %v441_v19 }
  0x29   : > { %184 = vrot.lane.b32.xlu0 %v183_v18, %s473_s15 }
  0x9b   : > { %v185_v22 = vpop.permute.xlu0 %184 }
  0x9c   : > { %v188_v23 = vsel %vm187_vm1, %v175_v21, %v185_v22 }
  0x9d   : > { %v189_v24 = vpack.c.bf16 %v188_v23, %v188_v23 }
  0x9f   : > { %302 = vmatmul.bf16.vlgmr.msra.gmra.mxu0 %v189_v24 }
  0xa3   : > { %v316_v25 = vpop.f32.mrf.mxu1 }
  0xab   : > { %v318_v26 = vpop.f32.mrf.mxu1 }
 0x11c   : > { %v303_v28 = vpop.f32.mrf.mxu0 }
 0x11d   : > { %v304_v29 = vadd.f32 %v462_v27, %v303_v28 }
 0x11f   : > { %v317_v30 = vadd.f32 %v316_v25, %v304_v29 }
 0x121   : > { %v321_v31 = vmin.f32 %v317_v30, 0.0  ;;  %vm320_vm3 = vcmp.gt.f32.partialorder %v317_v30, 0.0 }
 0x123   : > { %v322_v32 = vmul.f32 1.442695, %v321_v31 }
 0x124   : > { %v305_v33 = vpop.f32.mrf.mxu0 }
 0x125   : > { %463 = vpow2.f32 %v322_v32 }
 0x12b   : > { %v464_v34 = vpop.eup %463 }
 0x12c   : > { %v438_v35 = vadd.f32 -1.0, %v464_v34 }
 0x12e   : > { %v325_v36 = vsel %vm320_vm3, %v317_v30, %v438_v35 }
 0x12f   : > { %v326_v37 = vpack.c.bf16 %v325_v36, %v325_v36 }
 0x131   : > { %328 = vst.msk [vmem:[%s165_s23] sm:$0x3] %vm327_vm4, %v326_v37 }
 0x132 PF: > { %s13_s12 = sadd.s32 1, %s471_s12  }
 0x133   : > { %p10_p4 = scmp.ge.s32.totalorder %s13_s12, 4  }
 0x135   :  { %12 = sbr.rel (!%p10_p4) target bundleno = 1 (0x1), region = 62 }

// kernel: cnn_autoencoder_v2_forward.10
= control target key start
LH: loop header
LB: loop body
LE: loop exit
PB: predicated region body
PF: predicated region fallthrough
CT: control target
= control target key end

     0   :  { %s405_s12 = smov 0   ;;  %s450_s0 = inlined_call_operand.vmem [shape: bf16[2,8,32], index: 0, kind: input, shape index: {}]   ;;  %s451_s1 = inlined_call_operand.vmem [shape: bf16[96,32], index: 1, kind: input, shape index: {}]   ;;  %s452_s2 = inlined_call_operand.vmem [shape: f32[1,32], index: 2, kind: input, shape index: {}]   ;;  %s453_s3 = inlined_call_operand.vmem [shape: bf16[2,8,32], index: 3, kind: output, shape index: {}]  }
   0x1 LB: > { %s321_s13 = sadd.s32 4294967295, %s381_s12   ;;  %p325_p0 = scmp.ge.s32.totalorder %s381_s12, 1  ;;  %s381_s12 = sphi %s405_s12, %s13_s12  }
   0x2   : > { %p136_p1 = scmp.lt.s32.totalorder %s381_s12, 3 }
   0x4   : > { %p137_p2 = pnand %p325_p0, %p136_p1 }
   0x5   : > { %p158_p3 = scmp.lt.s32.totalorder (!%p137_p2), %s321_s13, 1  ;;  %s383_s24 = smov (!%p137_p2), 32  }
   0x6   : > { %140 = sbr.rel (%p137_p2) target bundleno = 288 (0x120), region = 32  ;;  %s384_s25 = smov (!%p137_p2), 64  }
   0xb   : > { %v361_v0 = vld [vmem:[%s451_s1 + $0x28] sm:$0xff]  ;;  %s455_s13 = smov (!%p158_p3, %s321_s13), 1  ;;  %v360_v1 = vld [vmem:[%s451_s1 + $0x20] sm:$0xff]  ;;  %v359_v3 = vld [vmem:[%s451_s1 + $0x18] sm:$0xff]  ;;  %vm176_vm0 = vcmask 1046528   ;;  %vm172_vm1 = vcmask 1040384  }
   0xc   : > { %248 = vmatpush.bf16.msra.mxu0 %v361_v0  ;;  %s326_s18 = sshll.u32 %s455_s13, 2  ;;  %v358_v7 = vld [vmem:[%s451_s1 + $0x10] sm:$0xff]  ;;  %v357_v8 = vld [vmem:[%s451_s1 + $0x8] sm:$0xff]  ;;  %v356_v9 = vld [vmem:[%s451_s1] sm:$0xff]  ;;  %vm185_vm2 = vcmask 261120   ;;  %vm187_vm3 = vcmask 523264  }
   0xd   : > { %s161_s21 = scalar_lea.vmem %s450_s0, %s326_s18  ;;  %vm242_vm4 = vcmask 785408   ;;  %v372_v17 = vld [vmem:[%s452_s2] ss:$0 sm:$0xff]  ;;  %s165_s9 = scalar_lea.vmem %s453_s3, %s326_s18  ;;  %vm266_vm6 = vcmask 257024  }
   0xe   : > { %v167_v2 = vld [vmem:[%s161_s21] sm:$0xf] }
   0xf   : > { %v168_v4 = vunpack.c.l.bf16 %v167_v2 }
  0x10   : > { %249 = vmatpush.bf16.msra.mxu0 %v360_v1 }
  0x11   : > { %178 = vrot.lane.b32.xlu0 %v168_v4, %s383_s24  ;;  %v174_v5 = vrot.slane %v168_v4, 1  ;;  %v170_v11 = vrot.slane %v168_v4, 7 }
  0x13   : > { %v177_v6 = vsel %vm176_vm0, %v174_v5, 0.0  ;;  %v173_v12 = vsel %vm172_vm1, 0.0, %v170_v11 }
  0x14   : > { %250 = vmatpush.bf16.msra.mxu0 %v359_v3 }
  0x18   : > { %251 = vmatpush.bf16.msra.mxu0 %v358_v7 }
  0x19   : > { %182 = vrot.lane.b32.xlu0 %v177_v6, %s384_s25 }
  0x1c   : > { %252 = vmatpush.bf16.msra.mxu0 %v357_v8 }
  0x20   : > { %253 = vmatpush.bf16.msra.mxu0 %v356_v9 }
  0x83   : > { %v179_v10 = vpop.permute.xlu0 %178 }
  0x84   : > { %v186_v13 = vsel %vm185_vm2, %v173_v12, %v179_v10 }
  0x8b   : > { %v183_v14 = vpop.permute.xlu0 %182 }
  0x8c   : > { %v188_v15 = vsel %vm187_vm3, %v186_v13, %v183_v14 }
  0x8d   : > { %v189_v16 = vpack.c.bf16 %v188_v15, %v188_v15 }
  0x8f   : > { %352 = vmatmul.msk.bf16.vlgmr.msra.gmra.mxu0 %vm242_vm4, %v189_v16 }
 0x10c   : > { %v255_v18 = vpop.f32.mrf.mxu0 }
 0x10d   : > { %v256_v19 = vadd.f32 %v372_v17, %v255_v18 }
 0x10f   : > { %v260_v20 = vmin.f32 %v256_v19, 0.0  ;;  %vm259_vm5 = vcmp.gt.f32.partialorder %v256_v19, 0.0 }
 0x111   : > { %v261_v21 = vmul.f32 1.442695, %v260_v20 }
 0x113   : > { %373 = vpow2.f32 %v261_v21 }
 0x114   : > { %v257_v22 = vpop.f32.mrf.mxu0 }
 0x119   : > { %v374_v23 = vpop.eup %373 }
 0x11a   : > { %v353_v24 = vadd.f32 -1.0, %v374_v23 }
 0x11c   : > { %v264_v25 = vsel %vm259_vm5, %v256_v19, %v353_v24 }
 0x11d   : > { %v265_v26 = vpack.c.bf16 %v264_v25, %v264_v25 }
 0x11f   : > { %267 = vst.msk [vmem:[%s165_s9] sm:$0xf] %vm266_vm6, %v265_v26 }
 0x120 PF: > { %s13_s12 = sadd.s32 1, %s381_s12  }
 0x121   : > { %p10_p4 = scmp.ge.s32.totalorder %s13_s12, 4  }
 0x123   :  { %12 = sbr.rel (!%p10_p4) target bundleno = 1 (0x1), region = 62 }

// kernel: cnn_autoencoder_v2_forward.11
= control target key start
LH: loop header
LB: loop body
LE: loop exit
PB: predicated region body
PF: predicated region fallthrough
CT: control target
= control target key end

     0   :  { %s422_s14 = smov 0   ;;  %s452_s0 = inlined_call_operand.vmem [shape: bf16[2,16,16], index: 0, kind: input, shape index: {}]   ;;  %s453_s1 = inlined_call_operand.vmem [shape: bf16[48,1], index: 1, kind: input, shape index: {}]   ;;  %s454_s2 = inlined_call_operand.<no memory space> [shape: f32[1,1], index: 2, kind: input, shape index: {}]   ;;  %s455_s3 = inlined_call_operand.vmem [shape: f32[2,16,1], index: 3, kind: output, shape index: {}]  }
   0x1   :  { %v8_v0 = vstv %s454_s2 }
   0x2   :  { %9 = vst [vmem:[#allocation2] sm:$0x1] %v8_v0 }
   0x3 LB: > { %s329_s15 = sadd.s32 4294967295, %s395_s14   ;;  %p333_p0 = scmp.ge.s32.totalorder %s395_s14, 1  ;;  %s395_s14 = sphi %s422_s14, %s15_s14  }
   0x4   : > { %p139_p1 = scmp.lt.s32.totalorder %s395_s14, 3 }
   0x6   : > { %p140_p2 = pnand %p333_p0, %p139_p1 }
   0x7   : > { %p163_p3 = scmp.lt.s32.totalorder (!%p140_p2), %s329_s15, 1  ;;  %s397_s19 = smov (!%p140_p2), 16  }
   0x8   : > { %143 = sbr.rel (%p140_p2) target bundleno = 300 (0x12c), region = 32  ;;  %s398_s20 = smov (!%p140_p2), 32  }
   0xd   : > { %s457_s15 = smov (!%p163_p3, %s329_s15), 1  ;;  %vm187_vm0 = vcmask 1046528   ;;  %v359_v10 = vld [vmem:[%s453_s1 + $0x10] sm:$0xff]  ;;  %v358_v11 = vld [vmem:[%s453_s1 + $0x8] sm:$0xff]  ;;  %v357_v12 = vld [vmem:[%s453_s1] sm:$0xff]  ;;  %vm180_vm1 = vcmask 1040384  }
   0xe   : > { %s355_s2 = sshll.u32 %s457_s15, 3  ;;  %250 = vmatpush.bf16.msra.mxu0 %v359_v10  ;;  %vm206_vm2 = vcmask 130048   ;;  %vm209_vm3 = vcmask 261120   ;;  %vm241_vm4 = vcmask 392192   ;;  %v384_v28 = vld [vmem:[#allocation2] ss:$0 sm:$0xff] }
   0xf   : > { %s167_s18 = scalar_lea.vmem %s452_s0, %s355_s2  ;;  %s356_s27 = sshll.u32 %s457_s15, 4  ;;  %vm271_vm5 = vcmask 7168  }
  0x10   : > { %v361_v1 = vld [vmem:[%s167_s18] sm:$0xff]   ;;  %s172_s30 = scalar_lea.vmem %s455_s3, %s356_s27 }
  0x11   : > { %v362_v2 = vunpack.c.l.bf16 %v361_v1  ;;  %v363_v3 = vunpack.c.h.bf16 %v361_v1 }
  0x12   : > { %251 = vmatpush.bf16.msra.mxu0 %v358_v11 }
  0x13   : > { %v374_v4 = vpack.i.bf16 %v363_v3, %v362_v2  ;;  %v188_v5 = vrot.slane %v362_v2, 1  ;;  %v189_v6 = vrot.slane %v363_v3, 1  ;;  %v182_v14 = vrot.slane %v363_v3, 7 }
  0x14   : > { %v181_v15 = vrot.slane %v362_v2, 7 }
  0x15   : > { %375 = vrot.lane.b32.xlu0 %v374_v4, %s397_s19  ;;  %v190_v7 = vsel %vm187_vm0, %v188_v5, %v189_v6  ;;  %v192_v8 = vsel %vm187_vm0, %v189_v6, 0.0 }
  0x16   : > { %v379_v9 = vpack.i.bf16 %v192_v8, %v190_v7  ;;  %252 = vmatpush.bf16.msra.mxu0 %v357_v12  ;;  %v183_v18 = vsel %vm180_vm1, %v181_v15, %v182_v14  ;;  %v186_v19 = vsel %vm180_vm1, 0.0, %v181_v15 }
  0x1d   : > { %380 = vrot.lane.b32.xlu0 %v379_v9, %s398_s20 }
  0x87   : > { %v376_v13 = vpop.permute.xlu0 %375 }
  0x88   : > { %v378_v16 = vunpack.i.h.bf16 %v376_v13  ;;  %v377_v17 = vunpack.i.l.bf16 %v376_v13 }
  0x8a   : > { %v207_v23 = vsel %vm206_vm2, %v186_v19, %v377_v17  ;;  %v208_v24 = vsel %vm206_vm2, %v183_v18, %v378_v16 }
  0x8f   : > { %v381_v20 = vpop.permute.xlu0 %380 }
  0x90   : > { %v383_v21 = vunpack.i.h.bf16 %v381_v20  ;;  %v382_v22 = vunpack.i.l.bf16 %v381_v20 }
  0x92   : > { %v210_v25 = vsel %vm209_vm3, %v207_v23, %v382_v22  ;;  %v211_v26 = vsel %vm209_vm3, %v208_v24, %v383_v21 }
  0x93   : > { %v212_v27 = vpack.c.bf16 %v211_v26, %v210_v25 }
  0x95   : > { %350 = vmatmul.msk.bf16.vlgmr.msra.gmra.mxu0 %vm241_vm4, %v212_v27 }
 0x112   : > { %v254_v29 = vpop.f32.mrf.mxu0 }
 0x113   : > { %v255_v30 = vadd.f32 %v384_v28, %v254_v29 }
 0x115   : > { %v261_v31 = vmin.f32 %v255_v30, 0.0  ;;  %vm259_vm6 = vcmp.gt.f32.partialorder %v255_v30, 0.0 }
 0x117   : > { %v263_v32 = vmul.f32 1.442695, %v261_v31 }
 0x119   : > { %385 = vpow2.f32 %v263_v32 }
 0x11a   : > { %v256_v33 = vpop.f32.mrf.mxu0 }
 0x11b   : > { %v257_v34 = vadd.f32 %v384_v28, %v256_v33 }
 0x11d   : > { %v262_v35 = vmin.f32 %v257_v34, 0.0  ;;  %vm260_vm7 = vcmp.gt.f32.partialorder %v257_v34, 0.0 }
 0x11f   : > { %v386_v36 = vpop.eup %385  ;;  %v265_v37 = vmul.f32 1.442695, %v262_v35 }
 0x120   : > { %v351_v38 = vadd.f32 -1.0, %v386_v36 }
 0x121   : > { %387 = vpow2.f32 %v265_v37 }
 0x122   : > { %v269_v39 = vsel %vm259_vm6, %v255_v30, %v351_v38 }
 0x123   : > { %272 = vst.msk [vmem:[%s172_s30] sm:$0xff] %vm271_vm5, %v269_v39 }
 0x127   : > { %v388_v40 = vpop.eup %387 }
 0x128   : > { %v352_v41 = vadd.f32 -1.0, %v388_v40 }
 0x12a   : > { %v270_v42 = vsel %vm260_vm7, %v257_v34, %v352_v41 }
 0x12b   : > { %273 = vst.msk [vmem:[%s172_s30 + $0x8] sm:$0xff] %vm271_vm5, %v270_v42 }
 0x12c PF: > { %s15_s14 = sadd.s32 1, %s395_s14  }
 0x12d   : > { %p12_p4 = scmp.ge.s32.totalorder %s15_s14, 4  }
 0x12f   :  { %14 = sbr.rel (!%p12_p4) target bundleno = 3 (0x3), region = 62 }

</bundles_post_ra>
